<compile_context>
chip_gen: v7x
topology: tpu7x:2x2x1
jax: 0.10.0
libtpu: 0.0.40
codegen_flags: <defaults>
</compile_context>

<pallas_src>
import jax
import jax.numpy as jnp
from jax.experimental import pallas as pl
from jax.experimental.pallas import tpu as pltpu

NUM_REPEATS = 10  # loop count in the PyTorch forward


def _cat_mm_kernel(x1_ref, x2_ref, out_ref, acc_ref):
    k = pl.program_id(2)

    @pl.when(k == 0)
    def _init():
        acc_ref[...] = jnp.zeros_like(acc_ref)

    acc_ref[...] += jnp.dot(
        x1_ref[...], x2_ref[...], preferred_element_type=jnp.float32
    )

    @pl.when(k == pl.num_programs(2) - 1)
    def _writeback():
        v1 = acc_ref[...].astype(out_ref.dtype)
        # 10 slice-stores into the (tm, 10, tn) output block.  The last dim
        # (tn) is lane-dense; the replication axis equals the full array dim.
        for r in range(NUM_REPEATS):
            out_ref[:, r, :] = v1


def _tile_candidates(dim):
    cands = [c for c in (512, 256, 128) if dim % c == 0]
    return cands if cands else [dim]  # full-extent fallback (small shapes)


def _pick_tiles(M, N, K, vmem_budget_bytes, in_itemsize):
    """Pick (tm, tn, tk) from MXU-grain divisors that fit the VMEM budget."""
    rep_pad = ((NUM_REPEATS + 7) // 8) * 8  # sublane-padded copy axis in VMEM

    def vmem_cost(tm, tn, tk):
        in_bufs = 2 * (tm * tk + tk * tn) * in_itemsize  # double-buffered
        out_bufs = 2 * tm * rep_pad * tn * 4              # double-buffered
        acc = tm * tn * 4
        return in_bufs + out_bufs + acc

    best = None
    for tm in _tile_candidates(M):
        for tn in _tile_candidates(N):
            for tk in _tile_candidates(K):
                if vmem_cost(tm, tn, tk) > vmem_budget_bytes:
                    continue
                key = (tm * tn * tk, tn, tm)  # prefer big tiles, lane-dense tn
                if best is None or key > best[0]:
                    best = (key, (tm, tn, tk))
    if best is None:
        tm = _tile_candidates(M)[-1]
        tn = _tile_candidates(N)[-1]
        tk = _tile_candidates(K)[-1]
    else:
        tm, tn, tk = best[1]

    # v7x megacore: guarantee >= 2 iterations on the parallel (i, j) axes when
    # the shape allows it, so both TensorCores get work.
    if (M // tm) * (N // tn) < 2:
        for c in (256, 128):
            if c < tm and M % c == 0 and M // c >= 2:
                tm = c
                break
    return tm, tn, tk


def cat_mm(x1: jax.Array, x2: jax.Array, *, cast_inputs_to_bf16=False) -> jax.Array:
    M, K = x1.shape
    K2, N = x2.shape
    assert K == K2, "forward requires x1:(M,K), x2:(K,N)"

    out_dtype = jnp.result_type(x1.dtype, x2.dtype)
    if cast_inputs_to_bf16:
        # Precision tradeoff: bf16 MXU inputs, f32 accumulate, f32 output.
        x1 = x1.astype(jnp.bfloat16)
        x2 = x2.astype(jnp.bfloat16)

    # Generation-aware VMEM budgeting (v7x: 64 MiB, v5e/v6e: 128 MiB).
    try:
        vmem_cap = int(pltpu.get_tpu_info().vmem_capacity_bytes)
    except Exception:
        vmem_cap = 64 * 1024 * 1024  # conservative default (v7x-sized)
    vmem_limit = max(min(int(0.75 * vmem_cap), 100 * 1024 * 1024),
                     32 * 1024 * 1024)

    in_itemsize = jnp.dtype(x1.dtype).itemsize
    tm, tn, tk = _pick_tiles(M, N, K, int(0.8 * vmem_limit), in_itemsize)
    grid = (M // tm, N // tn, K // tk)

    out_itemsize = jnp.dtype(out_dtype).itemsize
    cost = pl.CostEstimate(
        flops=2 * M * N * K,
        transcendentals=0,
        bytes_accessed=(
            grid[1] * M * K * in_itemsize                       # x1 re-reads per N tile
            + grid[0] * K * N * jnp.dtype(x2.dtype).itemsize    # x2 re-reads per M tile
            + NUM_REPEATS * M * N * out_itemsize                # 10x output writeback
        ),
    )

    out3 = pl.pallas_call(
        _cat_mm_kernel,
        out_shape=jax.ShapeDtypeStruct((M, NUM_REPEATS, N), out_dtype),
        grid_spec=pltpu.PrefetchScalarGridSpec(
            num_scalar_prefetch=0,
            grid=grid,
            in_specs=[
                pl.BlockSpec((tm, tk), lambda i, j, k: (i, k)),
                pl.BlockSpec((tk, tn), lambda i, j, k: (k, j)),
            ],
            # Output block is resident across the K-reduction axis only.
            out_specs=pl.BlockSpec(
                (tm, NUM_REPEATS, tn), lambda i, j, k: (i, 0, j)
            ),
            scratch_shapes=[pltpu.VMEM((tm, tn), jnp.float32)],
        ),
        compiler_params=pltpu.CompilerParams(
            dimension_semantics=("parallel", "parallel", "arbitrary"),
            vmem_limit_bytes=vmem_limit,
        ),
        cost_estimate=cost,
    )(x1, x2)

    # (M, 10, N) row-major is bit-identical to concat([v1]*10, axis=1): free reshape.
    return out3.reshape(M, NUM_REPEATS * N)


def cat_mm_ref(x1, x2):
    v1 = x1 @ x2
    return jnp.concatenate([v1] * NUM_REPEATS, axis=1)


if __name__ == "__main__":
    key = jax.random.PRNGKey(0)
    k1, k2 = jax.random.split(key)
    M, K = 8, 32  # small shapes consistent with the forward (x1:(M,K), x2:(K,N))
    N = 8
    x1 = jax.random.normal(k1, (M, K), dtype=jnp.float32)
    x2 = jax.random.normal(k2, (K, N), dtype=jnp.float32)

    out = cat_mm(x1, x2)
    jax.block_until_ready(out)

    ref = cat_mm_ref(x1, x2)
    assert out.shape == (M, NUM_REPEATS * N)
    assert jnp.allclose(out, ref, atol=1e-5, rtol=1e-5)
    print("KERNEL_OK")
</pallas_src>

<mosaic_0001>
module attributes {stable_mosaic.version = 11 : i64} {
  func.func @_cat_mm_kernel(%arg0: i32, %arg1: i32, %arg2: i32, %arg3: memref<8x32xf32, #tpu.memory_space<vmem>>, %arg4: memref<32x8xf32, #tpu.memory_space<vmem>>, %arg5: memref<8x10x8xf32, #tpu.memory_space<vmem>>, %arg6: memref<8x8xf32, #tpu.memory_space<vmem>>) attributes {dimension_semantics = [#tpu.dimension_semantics<parallel>, #tpu.dimension_semantics<parallel>, #tpu.dimension_semantics<arbitrary>], iteration_bounds = array<i64: 1, 1, 1>, scalar_prefetch = 0 : i64, scratch_operands = 1 : i64, tpu.core_type = #tpu.core_type<tc>, window_params = [{transform_indices = @transform_0, window_bounds = array<i64: 8, 32>}, {transform_indices = @transform_1, window_bounds = array<i64: 32, 8>}, {transform_indices = @transform_2, window_bounds = array<i64: 8, 10, 8>}]} {
    %c0_i32 = arith.constant 0 : i32
    %0 = arith.cmpi eq, %arg2, %c0_i32 : i32
    %1 = arith.extui %0 : i1 to i32
    %c0_i32_0 = arith.constant 0 : i32
    %2 = arith.cmpi ne, %1, %c0_i32_0 : i32
    scf.if %2 {
      %cst_10 = arith.constant 0.000000e+00 : f32
      %12 = vector.broadcast %cst_10 : f32 to vector<8x8xf32>
      %c0_11 = arith.constant 0 : index
      %c0_12 = arith.constant 0 : index
      %13 = vector.load %arg6[%c0_11, %c0_12] : memref<8x8xf32, #tpu.memory_space<vmem>>, vector<8x8xf32>
      tpu.vector_store %arg6[%c0_11, %c0_12], %12 {strides = array<i32>} : memref<8x8xf32, #tpu.memory_space<vmem>>, vector<8x8xf32>,
    } else {
    }
    %c0 = arith.constant 0 : index
    %c0_1 = arith.constant 0 : index
    %3 = vector.load %arg6[%c0, %c0_1] : memref<8x8xf32, #tpu.memory_space<vmem>>, vector<8x8xf32>
    %c0_2 = arith.constant 0 : index
    %c0_3 = arith.constant 0 : index
    %4 = vector.load %arg3[%c0_2, %c0_3] : memref<8x32xf32, #tpu.memory_space<vmem>>, vector<8x32xf32>
    %c0_4 = arith.constant 0 : index
    %c0_5 = arith.constant 0 : index
    %5 = vector.load %arg4[%c0_4, %c0_5] : memref<32x8xf32, #tpu.memory_space<vmem>>, vector<32x8xf32>
    %cst = arith.constant dense<0.000000e+00> : vector<8x8xf32>
    %6 = tpu.matmul %4, %5, %cst {dimension_numbers = #tpu.dot_dimension_numbers<[1], [0], [0], [1], [0, 0, 1, 1], [], []>} : vector<8x32xf32>, vector<32x8xf32>, vector<8x8xf32> -> vector<8x8xf32>
    %7 = arith.addf %3, %6 : vector<8x8xf32>
    %c0_6 = arith.constant 0 : index
    %c0_7 = arith.constant 0 : index
    %8 = vector.load %arg6[%c0_6, %c0_7] : memref<8x8xf32, #tpu.memory_space<vmem>>, vector<8x8xf32>
    tpu.vector_store %arg6[%c0_6, %c0_7], %7 {strides = array<i32>} : memref<8x8xf32, #tpu.memory_space<vmem>>, vector<8x8xf32>,
    %c0_i32_8 = arith.constant 0 : i32
    %9 = arith.cmpi eq, %arg2, %c0_i32_8 : i32
    %10 = arith.extui %9 : i1 to i32
    %c0_i32_9 = arith.constant 0 : i32
    %11 = arith.cmpi ne, %10, %c0_i32_9 : i32
    scf.if %11 {
      %c0_10 = arith.constant 0 : index
      %c0_11 = arith.constant 0 : index
      %12 = vector.load %arg6[%c0_10, %c0_11] : memref<8x8xf32, #tpu.memory_space<vmem>>, vector<8x8xf32>
      %c0_12 = arith.constant 0 : index
      %c0_13 = arith.constant 0 : index
      %c0_14 = arith.constant 0 : index
      %13 = vector.load %arg5[%c0_12, %c0_13, %c0_14] : memref<8x10x8xf32, #tpu.memory_space<vmem>>, vector<8x1x8xf32>
      %14 = vector.shape_cast %13 : vector<8x1x8xf32> to vector<8x8xf32>
      %15 = vector.shape_cast %12 : vector<8x8xf32> to vector<8x1x8xf32>
      tpu.vector_store %arg5[%c0_12, %c0_13, %c0_14], %15 {strides = array<i32>} : memref<8x10x8xf32, #tpu.memory_space<vmem>>, vector<8x1x8xf32>,
      %c0_15 = arith.constant 0 : index
      %c1 = arith.constant 1 : index
      %c0_16 = arith.constant 0 : index
      %16 = vector.load %arg5[%c0_15, %c1, %c0_16] : memref<8x10x8xf32, #tpu.memory_space<vmem>>, vector<8x1x8xf32>
      %17 = vector.shape_cast %16 : vector<8x1x8xf32> to vector<8x8xf32>
      %18 = vector.shape_cast %12 : vector<8x8xf32> to vector<8x1x8xf32>
      tpu.vector_store %arg5[%c0_15, %c1, %c0_16], %18 {strides = array<i32>} : memref<8x10x8xf32, #tpu.memory_space<vmem>>, vector<8x1x8xf32>,
      %c0_17 = arith.constant 0 : index
      %c2 = arith.constant 2 : index
      %c0_18 = arith.constant 0 : index
      %19 = vector.load %arg5[%c0_17, %c2, %c0_18] : memref<8x10x8xf32, #tpu.memory_space<vmem>>, vector<8x1x8xf32>
      %20 = vector.shape_cast %19 : vector<8x1x8xf32> to vector<8x8xf32>
      %21 = vector.shape_cast %12 : vector<8x8xf32> to vector<8x1x8xf32>
      tpu.vector_store %arg5[%c0_17, %c2, %c0_18], %21 {strides = array<i32>} : memref<8x10x8xf32, #tpu.memory_space<vmem>>, vector<8x1x8xf32>,
      %c0_19 = arith.constant 0 : index
      %c3 = arith.constant 3 : index
      %c0_20 = arith.constant 0 : index
      %22 = vector.load %arg5[%c0_19, %c3, %c0_20] : memref<8x10x8xf32, #tpu.memory_space<vmem>>, vector<8x1x8xf32>
      %23 = vector.shape_cast %22 : vector<8x1x8xf32> to vector<8x8xf32>
      %24 = vector.shape_cast %12 : vector<8x8xf32> to vector<8x1x8xf32>
      tpu.vector_store %arg5[%c0_19, %c3, %c0_20], %24 {strides = array<i32>} : memref<8x10x8xf32, #tpu.memory_space<vmem>>, vector<8x1x8xf32>,
      %c0_21 = arith.constant 0 : index
      %c4 = arith.constant 4 : index
      %c0_22 = arith.constant 0 : index
      %25 = vector.load %arg5[%c0_21, %c4, %c0_22] : memref<8x10x8xf32, #tpu.memory_space<vmem>>, vector<8x1x8xf32>
      %26 = vector.shape_cast %25 : vector<8x1x8xf32> to vector<8x8xf32>
      %27 = vector.shape_cast %12 : vector<8x8xf32> to vector<8x1x8xf32>
      tpu.vector_store %arg5[%c0_21, %c4, %c0_22], %27 {strides = array<i32>} : memref<8x10x8xf32, #tpu.memory_space<vmem>>, vector<8x1x8xf32>,
      %c0_23 = arith.constant 0 : index
      %c5 = arith.constant 5 : index
      %c0_24 = arith.constant 0 : index
      %28 = vector.load %arg5[%c0_23, %c5, %c0_24] : memref<8x10x8xf32, #tpu.memory_space<vmem>>, vector<8x1x8xf32>
      %29 = vector.shape_cast %28 : vector<8x1x8xf32> to vector<8x8xf32>
      %30 = vector.shape_cast %12 : vector<8x8xf32> to vector<8x1x8xf32>
      tpu.vector_store %arg5[%c0_23, %c5, %c0_24], %30 {strides = array<i32>} : memref<8x10x8xf32, #tpu.memory_space<vmem>>, vector<8x1x8xf32>,
      %c0_25 = arith.constant 0 : index
      %c6 = arith.constant 6 : index
      %c0_26 = arith.constant 0 : index
      %31 = vector.load %arg5[%c0_25, %c6, %c0_26] : memref<8x10x8xf32, #tpu.memory_space<vmem>>, vector<8x1x8xf32>
      %32 = vector.shape_cast %31 : vector<8x1x8xf32> to vector<8x8xf32>
      %33 = vector.shape_cast %12 : vector<8x8xf32> to vector<8x1x8xf32>
      tpu.vector_store %arg5[%c0_25, %c6, %c0_26], %33 {strides = array<i32>} : memref<8x10x8xf32, #tpu.memory_space<vmem>>, vector<8x1x8xf32>,
      %c0_27 = arith.constant 0 : index
      %c7 = arith.constant 7 : index
      %c0_28 = arith.constant 0 : index
      %34 = vector.load %arg5[%c0_27, %c7, %c0_28] : memref<8x10x8xf32, #tpu.memory_space<vmem>>, vector<8x1x8xf32>
      %35 = vector.shape_cast %34 : vector<8x1x8xf32> to vector<8x8xf32>
      %36 = vector.shape_cast %12 : vector<8x8xf32> to vector<8x1x8xf32>
      tpu.vector_store %arg5[%c0_27, %c7, %c0_28], %36 {strides = array<i32>} : memref<8x10x8xf32, #tpu.memory_space<vmem>>, vector<8x1x8xf32>,
      %c0_29 = arith.constant 0 : index
      %c8 = arith.constant 8 : index
      %c0_30 = arith.constant 0 : index
      %37 = vector.load %arg5[%c0_29, %c8, %c0_30] : memref<8x10x8xf32, #tpu.memory_space<vmem>>, vector<8x1x8xf32>
      %38 = vector.shape_cast %37 : vector<8x1x8xf32> to vector<8x8xf32>
      %39 = vector.shape_cast %12 : vector<8x8xf32> to vector<8x1x8xf32>
      tpu.vector_store %arg5[%c0_29, %c8, %c0_30], %39 {strides = array<i32>} : memref<8x10x8xf32, #tpu.memory_space<vmem>>, vector<8x1x8xf32>,
      %c0_31 = arith.constant 0 : index
      %c9 = arith.constant 9 : index
      %c0_32 = arith.constant 0 : index
      %40 = vector.load %arg5[%c0_31, %c9, %c0_32] : memref<8x10x8xf32, #tpu.memory_space<vmem>>, vector<8x1x8xf32>
      %41 = vector.shape_cast %40 : vector<8x1x8xf32> to vector<8x8xf32>
      %42 = vector.shape_cast %12 : vector<8x8xf32> to vector<8x1x8xf32>
      tpu.vector_store %arg5[%c0_31, %c9, %c0_32], %42 {strides = array<i32>} : memref<8x10x8xf32, #tpu.memory_space<vmem>>, vector<8x1x8xf32>,
    } else {
    }
    return
  }
  func.func @transform_0(%arg0: i32, %arg1: i32, %arg2: i32) -> (i32, i32) {
    %c0_i32 = arith.constant 0 : i32
    return %arg0, %arg2 : i32, i32
  }
  func.func @transform_1(%arg0: i32, %arg1: i32, %arg2: i32) -> (i32, i32) {
    %c0_i32 = arith.constant 0 : i32
    return %arg2, %arg1 : i32, i32
  }
  func.func @transform_2(%arg0: i32, %arg1: i32, %arg2: i32) -> (i32, i32, i32) {
    %c0_i32 = arith.constant 0 : i32
    %c0_i32_0 = arith.constant 0 : i32
    return %arg0, %c0_i32, %arg1 : i32, i32, i32
  }
}

</mosaic_0001>

<bundles_post_ra>
// kernel: tpu_custom_call.1
= control target key start
LH: loop header
LB: loop body
LE: loop exit
PB: predicated region body
PF: predicated region fallthrough
CT: control target
= control target key end

     0   :  { %vm15_vm0 = vcmask 64512   ;;  %v275_v0 = vmov 0.0|0.0   ;;  %v276_v4 = vmov 0.0   ;;  %vm277_vm1 = vmmov 0   ;;  %s631_s1 = inlined_call_operand.vmem [shape: f32[32,8], index: 1, kind: input, shape index: {}]   ;;  %s632_s0 = inlined_call_operand.vmem [shape: f32[8,32], index: 0, kind: input, shape index: {}]   ;;  %s633_s2 = inlined_call_operand.vmem [shape: f32[8,10,8], index: 2, kind: output, shape index: {}]  }
   0x1   :  { %264 = vmatprep.subr.bf16.mxu0 %v275_v0  ;;  %v19_v1 = vld [vmem:[%s631_s1] sm:$0xff]  ;;  %v20_v2 = vld [vmem:[%s631_s1 + $0x8] sm:$0xff]  ;;  %v21_v3 = vld [vmem:[%s631_s1 + $0x10] sm:$0xff]  ;;  %16 = vst.msk [vmem:[#allocation2] sm:$0xff] %vm15_vm0, %v276_v4  ;;  %261 = vmatprep.mubr.msk.f32.mxu0 %vm277_vm1, %v276_v4  ;;  %vm23_vm2 = vcmask 261120   ;;  %v109_v12 = vlaneseq  ;;  %vm162_vm3 = vcmask 57344  }
   0x2   :  { %v265_v5 = vpack.c.bf16 %v20_v2, %v19_v1  ;;  %v22_v6 = vld [vmem:[%s631_s1 + $0x18] sm:$0xff]  ;;  %v18_v8 = vld [vmem:[%s632_s0] sm:$0xff]  ;;  %v278_v10 = vmov 1966171168  }
   0x3   :  { %v268_v7 = vpack.c.bf16 %v22_v6, %v21_v3  ;;  %v107_v11 = vunpack.c.l.s4 %v278_v10  ;;  %v110_v17 = vshrl.u32 %v109_v12, 7 }
   0x4   :  { %266 = vmatpush3.bf16.msra.mxu0 %v265_v5 }
   0x5   :  { %267 = vmatprep.subr.bf16.mxu0 %v275_v0  ;;  %v108_v16 = vunpack.c.0.s8 %v107_v11 }
   0x7   :  { %v111_v18 = vsub.s32 %v108_v16, %v110_v17 }
   0x8   :  { %269 = vmatpush3.bf16.msra.mxu0 %v268_v7  ;;  %v17_v9 = vld [vmem:[#allocation2] sm:$0xff] }
   0xb   :  { %262 = vmatmul.mubr.msk.f32.vlgmr.msra.gmra.mrb[0].mxu0 %vm23_vm2, %v18_v8 }
  0xde   :  { %v93_v13 = vpop.f32.mrb[0].mxu0 }
  0xdf   :  { %v97_v14 = vadd.f32 %v93_v13, %v17_v9  ;;  %v263_v15 = vpop.f32.mrb[1].mxu0 }
  0xe1   :  { %99 = vst.msk [vmem:[#allocation2] sm:$0xff] %vm15_vm0, %v97_v14 }
  0xe8   :  { %v103_v19 = vld [vmem:[#allocation2] sm:$0xff] }
  0xe9   :  { %v105_v20 = vcombine.high %v103_v19, %v103_v19  ;;  %v112_v21 = vrot.slane %v103_v19, %v111_v18 }
  0xeb   :  { %v119_v22 = vrot.slane %v105_v20, %v111_v18  ;;  %v120_v23 = vcombine.high %v112_v21, %v112_v21  ;;  %v128_v24 = vrot.slane %v112_v21, %v111_v18 }
  0xed   :  { %v121_v25 = vcombine.high %v119_v22, %v119_v22  ;;  %v135_v26 = vrot.slane %v119_v22, %v111_v18  ;;  %v142_v27 = vrot.slane %v120_v23, %v111_v18  ;;  %v150_v28 = vcombine.high %v128_v24, %v128_v24  ;;  %163 = vst.msk [vmem:[%s633_s2] sm:$0x1] %vm162_vm3, %v128_v24 }
  0xee   :  { %171 = vst.msk [vmem:[%s633_s2 + $0x1] sm:$0x1] %vm162_vm3, %v128_v24  ;;  %179 = vst.msk [vmem:[%s633_s2 + $0x2] sm:$0x1] %vm162_vm3, %v128_v24 }
  0xef   :  { %187 = vst.msk [vmem:[%s633_s2 + $0x3] sm:$0x1] %vm162_vm3, %v128_v24  ;;  %195 = vst.msk [vmem:[%s633_s2 + $0x4] sm:$0x1] %vm162_vm3, %v128_v24  ;;  %v149_v29 = vrot.slane %v121_v25, %v111_v18  ;;  %v151_v30 = vcombine.high %v135_v26, %v135_v26  ;;  %v152_v31 = vcombine.high %v142_v27, %v142_v27 }
  0xf0   :  { %203 = vst.msk [vmem:[%s633_s2 + $0x5] sm:$0x1] %vm162_vm3, %v128_v24  ;;  %211 = vst.msk [vmem:[%s633_s2 + $0x6] sm:$0x1] %vm162_vm3, %v128_v24 }
  0xf1   :  { %219 = vst.msk [vmem:[%s633_s2 + $0x7] sm:$0x1] %vm162_vm3, %v128_v24  ;;  %227 = vst.msk [vmem:[%s633_s2 + $0x8] sm:$0x1] %vm162_vm3, %v128_v24  ;;  %v153_v32 = vcombine.high %v149_v29, %v149_v29 }
  0xf2   :  { %235 = vst.msk [vmem:[%s633_s2 + $0x9] sm:$0x1] %vm162_vm3, %v128_v24  ;;  %164 = vst.msk [vmem:[%s633_s2 + $0x10] sm:$0x1] %vm162_vm3, %v142_v27 }
  0xf3   :  { %165 = vst.msk [vmem:[%s633_s2 + $0x20] sm:$0x1] %vm162_vm3, %v150_v28  ;;  %167 = vst.msk [vmem:[%s633_s2 + $0x40] sm:$0x1] %vm162_vm3, %v135_v26 }
  0xf4   :  { %172 = vst.msk [vmem:[%s633_s2 + $0x11] sm:$0x1] %vm162_vm3, %v142_v27  ;;  %173 = vst.msk [vmem:[%s633_s2 + $0x21] sm:$0x1] %vm162_vm3, %v150_v28 }
  0xf5   :  { %175 = vst.msk [vmem:[%s633_s2 + $0x41] sm:$0x1] %vm162_vm3, %v135_v26  ;;  %180 = vst.msk [vmem:[%s633_s2 + $0x12] sm:$0x1] %vm162_vm3, %v142_v27 }
  0xf6   :  { %181 = vst.msk [vmem:[%s633_s2 + $0x22] sm:$0x1] %vm162_vm3, %v150_v28  ;;  %183 = vst.msk [vmem:[%s633_s2 + $0x42] sm:$0x1] %vm162_vm3, %v135_v26 }
  0xf7   :  { %188 = vst.msk [vmem:[%s633_s2 + $0x13] sm:$0x1] %vm162_vm3, %v142_v27  ;;  %189 = vst.msk [vmem:[%s633_s2 + $0x23] sm:$0x1] %vm162_vm3, %v150_v28 }
  0xf8   :  { %191 = vst.msk [vmem:[%s633_s2 + $0x43] sm:$0x1] %vm162_vm3, %v135_v26  ;;  %196 = vst.msk [vmem:[%s633_s2 + $0x14] sm:$0x1] %vm162_vm3, %v142_v27 }
  0xf9   :  { %197 = vst.msk [vmem:[%s633_s2 + $0x24] sm:$0x1] %vm162_vm3, %v150_v28  ;;  %199 = vst.msk [vmem:[%s633_s2 + $0x44] sm:$0x1] %vm162_vm3, %v135_v26 }
  0xfa   :  { %204 = vst.msk [vmem:[%s633_s2 + $0x15] sm:$0x1] %vm162_vm3, %v142_v27  ;;  %205 = vst.msk [vmem:[%s633_s2 + $0x25] sm:$0x1] %vm162_vm3, %v150_v28 }
  0xfb   :  { %207 = vst.msk [vmem:[%s633_s2 + $0x45] sm:$0x1] %vm162_vm3, %v135_v26  ;;  %212 = vst.msk [vmem:[%s633_s2 + $0x16] sm:$0x1] %vm162_vm3, %v142_v27 }
  0xfc   :  { %213 = vst.msk [vmem:[%s633_s2 + $0x26] sm:$0x1] %vm162_vm3, %v150_v28  ;;  %215 = vst.msk [vmem:[%s633_s2 + $0x46] sm:$0x1] %vm162_vm3, %v135_v26 }
  0xfd   :  { %220 = vst.msk [vmem:[%s633_s2 + $0x17] sm:$0x1] %vm162_vm3, %v142_v27  ;;  %221 = vst.msk [vmem:[%s633_s2 + $0x27] sm:$0x1] %vm162_vm3, %v150_v28 }
  0xfe   :  { %223 = vst.msk [vmem:[%s633_s2 + $0x47] sm:$0x1] %vm162_vm3, %v135_v26  ;;  %228 = vst.msk [vmem:[%s633_s2 + $0x18] sm:$0x1] %vm162_vm3, %v142_v27 }
  0xff   :  { %229 = vst.msk [vmem:[%s633_s2 + $0x28] sm:$0x1] %vm162_vm3, %v150_v28  ;;  %231 = vst.msk [vmem:[%s633_s2 + $0x48] sm:$0x1] %vm162_vm3, %v135_v26 }
 0x100   :  { %236 = vst.msk [vmem:[%s633_s2 + $0x19] sm:$0x1] %vm162_vm3, %v142_v27  ;;  %237 = vst.msk [vmem:[%s633_s2 + $0x29] sm:$0x1] %vm162_vm3, %v150_v28 }
 0x101   :  { %239 = vst.msk [vmem:[%s633_s2 + $0x49] sm:$0x1] %vm162_vm3, %v135_v26  ;;  %166 = vst.msk [vmem:[%s633_s2 + $0x30] sm:$0x1] %vm162_vm3, %v152_v31 }
 0x102   :  { %168 = vst.msk [vmem:[%s633_s2 + $0x50] sm:$0x1] %vm162_vm3, %v149_v29  ;;  %169 = vst.msk [vmem:[%s633_s2 + $0x60] sm:$0x1] %vm162_vm3, %v151_v30 }
 0x103   :  { %174 = vst.msk [vmem:[%s633_s2 + $0x31] sm:$0x1] %vm162_vm3, %v152_v31  ;;  %176 = vst.msk [vmem:[%s633_s2 + $0x51] sm:$0x1] %vm162_vm3, %v149_v29 }
 0x104   :  { %177 = vst.msk [vmem:[%s633_s2 + $0x61] sm:$0x1] %vm162_vm3, %v151_v30  ;;  %182 = vst.msk [vmem:[%s633_s2 + $0x32] sm:$0x1] %vm162_vm3, %v152_v31 }
 0x105   :  { %184 = vst.msk [vmem:[%s633_s2 + $0x52] sm:$0x1] %vm162_vm3, %v149_v29  ;;  %185 = vst.msk [vmem:[%s633_s2 + $0x62] sm:$0x1] %vm162_vm3, %v151_v30 }
 0x106   :  { %190 = vst.msk [vmem:[%s633_s2 + $0x33] sm:$0x1] %vm162_vm3, %v152_v31  ;;  %192 = vst.msk [vmem:[%s633_s2 + $0x53] sm:$0x1] %vm162_vm3, %v149_v29 }
 0x107   :  { %193 = vst.msk [vmem:[%s633_s2 + $0x63] sm:$0x1] %vm162_vm3, %v151_v30  ;;  %198 = vst.msk [vmem:[%s633_s2 + $0x34] sm:$0x1] %vm162_vm3, %v152_v31 }
 0x108   :  { %200 = vst.msk [vmem:[%s633_s2 + $0x54] sm:$0x1] %vm162_vm3, %v149_v29  ;;  %201 = vst.msk [vmem:[%s633_s2 + $0x64] sm:$0x1] %vm162_vm3, %v151_v30 }
 0x109   :  { %206 = vst.msk [vmem:[%s633_s2 + $0x35] sm:$0x1] %vm162_vm3, %v152_v31  ;;  %208 = vst.msk [vmem:[%s633_s2 + $0x55] sm:$0x1] %vm162_vm3, %v149_v29 }
 0x10a   :  { %209 = vst.msk [vmem:[%s633_s2 + $0x65] sm:$0x1] %vm162_vm3, %v151_v30  ;;  %214 = vst.msk [vmem:[%s633_s2 + $0x36] sm:$0x1] %vm162_vm3, %v152_v31 }
 0x10b   :  { %216 = vst.msk [vmem:[%s633_s2 + $0x56] sm:$0x1] %vm162_vm3, %v149_v29  ;;  %217 = vst.msk [vmem:[%s633_s2 + $0x66] sm:$0x1] %vm162_vm3, %v151_v30 }
 0x10c   :  { %222 = vst.msk [vmem:[%s633_s2 + $0x37] sm:$0x1] %vm162_vm3, %v152_v31  ;;  %224 = vst.msk [vmem:[%s633_s2 + $0x57] sm:$0x1] %vm162_vm3, %v149_v29 }
 0x10d   :  { %225 = vst.msk [vmem:[%s633_s2 + $0x67] sm:$0x1] %vm162_vm3, %v151_v30  ;;  %230 = vst.msk [vmem:[%s633_s2 + $0x38] sm:$0x1] %vm162_vm3, %v152_v31 }
 0x10e   :  { %232 = vst.msk [vmem:[%s633_s2 + $0x58] sm:$0x1] %vm162_vm3, %v149_v29  ;;  %233 = vst.msk [vmem:[%s633_s2 + $0x68] sm:$0x1] %vm162_vm3, %v151_v30 }
 0x10f   :  { %238 = vst.msk [vmem:[%s633_s2 + $0x39] sm:$0x1] %vm162_vm3, %v152_v31  ;;  %240 = vst.msk [vmem:[%s633_s2 + $0x59] sm:$0x1] %vm162_vm3, %v149_v29 }
 0x110   :  { %241 = vst.msk [vmem:[%s633_s2 + $0x69] sm:$0x1] %vm162_vm3, %v151_v30  ;;  %170 = vst.msk [vmem:[%s633_s2 + $0x70] sm:$0x1] %vm162_vm3, %v153_v32 }
 0x111   :  { %178 = vst.msk [vmem:[%s633_s2 + $0x71] sm:$0x1] %vm162_vm3, %v153_v32  ;;  %186 = vst.msk [vmem:[%s633_s2 + $0x72] sm:$0x1] %vm162_vm3, %v153_v32 }
 0x112   :  { %194 = vst.msk [vmem:[%s633_s2 + $0x73] sm:$0x1] %vm162_vm3, %v153_v32  ;;  %202 = vst.msk [vmem:[%s633_s2 + $0x74] sm:$0x1] %vm162_vm3, %v153_v32 }
 0x113   :  { %210 = vst.msk [vmem:[%s633_s2 + $0x75] sm:$0x1] %vm162_vm3, %v153_v32  ;;  %218 = vst.msk [vmem:[%s633_s2 + $0x76] sm:$0x1] %vm162_vm3, %v153_v32 }
 0x114   :  { %226 = vst.msk [vmem:[%s633_s2 + $0x77] sm:$0x1] %vm162_vm3, %v153_v32  ;;  %234 = vst.msk [vmem:[%s633_s2 + $0x78] sm:$0x1] %vm162_vm3, %v153_v32 }
 0x115   :  { %242 = vst.msk [vmem:[%s633_s2 + $0x79] sm:$0x1] %vm162_vm3, %v153_v32 }

</bundles_post_ra>
